<compile_context>
chip_gen: v7x
topology: tpu7x:2x2x1
jax: 0.10.0
libtpu: 0.0.40
codegen_flags: <defaults>
</compile_context>

<pallas_src>
import jax
import jax.numpy as jnp
from jax.experimental import pallas as pl
from jax.experimental.pallas import tpu as pltpu

# ----------------------------- dimensions -----------------------------------
IN_DIM = 32      # synthetic encoder input features
HIDDEN = 32      # synthetic encoder / decoder hidden width
EMB_DIM = 50     # fixed by the module: nn.Linear(50, latent_dim)
LATENT = 8       # default latent_dim
OUT_DIM = 32     # synthetic decoder output features

XIN_W = IN_DIM + LATENT          # packed [x | eps] input width = 40

# --------------------- packed weight-slab row layout -------------------------
# One [W_ROWS, 128] bf16 slab (~28 KB), VMEM-resident (constant index_map).
R_WE1 = 0                        # we1             [IN_DIM, HIDDEN]      rows   0:32
R_WE2ML = 32                     # [we2 | we2@wml] [HIDDEN, EMB+2*LAT]   rows  32:64
R_WD1 = 64                       # wfd@wd1 folded  [LATENT, HIDDEN]      rows  64:72
R_WD2 = 72                       # wd2             [HIDDEN, OUT_DIM]     rows  72:104
R_BIAS = 104                     # 4 bias rows                           rows 104:108
W_ROWS = 112

# ------------------------- packed output-slab layout -------------------------
C_OUT = 0                        # outs      cols   0:32
C_EMB = C_OUT + OUT_DIM          # emb       cols  32:82
C_MU = C_EMB + EMB_DIM           # mu        cols  82:90
C_LV = C_MU + LATENT             # log_var   cols  90:98
C_Z = C_LV + LATENT              # z         cols  98:106
OUT_W = C_Z + LATENT             # 106 lanes total, no pad lanes

MAX_TILE_B = 2048


def _vae_kernel(xin_ref, w_ref, out_ref):
    xin = xin_ref[...]                               # [tile_b, 40] f32
    x = xin[:, :IN_DIM].astype(jnp.bfloat16)         # MXU operands in bf16
    eps = xin[:, IN_DIM:]                            # f32 reparam noise

    # encoder(x): Linear -> ReLU -> Linear  (elementwise stays f32 for v5e)
    we1 = w_ref[R_WE1:R_WE1 + IN_DIM, 0:HIDDEN]
    be1 = w_ref[R_BIAS + 0:R_BIAS + 1, 0:HIDDEN].astype(jnp.float32)
    h = jnp.maximum(jnp.dot(x, we1, preferred_element_type=jnp.float32) + be1, 0.0)

    # fused [emb | mu | log_var]: encoder L2 and enc_mu/enc_log_var share LHS h
    we2ml = w_ref[R_WE2ML:R_WE2ML + HIDDEN, 0:EMB_DIM + 2 * LATENT]
    be2ml = w_ref[R_BIAS + 1:R_BIAS + 2, 0:EMB_DIM + 2 * LATENT].astype(jnp.float32)
    em = jnp.dot(h.astype(jnp.bfloat16), we2ml,
                 preferred_element_type=jnp.float32) + be2ml
    emb = em[:, :EMB_DIM]
    mulv = em[:, EMB_DIM:]
    mu = mulv[:, :LATENT]
    log_var = mulv[:, LATENT:]

    # reparametrize: z = mu + exp(0.5 * log_var) * eps   (eps passed in)
    z = mu + jnp.exp(0.5 * log_var) * eps

    # decoder(fc_dec(z)): fc_dec folded into decoder's first Linear (exact fold)
    wd1 = w_ref[R_WD1:R_WD1 + LATENT, 0:HIDDEN]
    bd1 = w_ref[R_BIAS + 2:R_BIAS + 3, 0:HIDDEN].astype(jnp.float32)
    hd = jnp.maximum(
        jnp.dot(z.astype(jnp.bfloat16), wd1, preferred_element_type=jnp.float32) + bd1,
        0.0)

    wd2 = w_ref[R_WD2:R_WD2 + HIDDEN, 0:OUT_DIM]
    bd2 = w_ref[R_BIAS + 3:R_BIAS + 4, 0:OUT_DIM].astype(jnp.float32)
    outs = jnp.dot(hd.astype(jnp.bfloat16), wd2,
                   preferred_element_type=jnp.float32) + bd2

    # one lane-dense packed store: outs | emb | (mu,log_var) | z   (no pad lanes)
    out_ref[...] = jnp.concatenate([outs, emb, mulv, z], axis=-1)


def _round_up(n, m):
    return ((n + m - 1) // m) * m


def _choose_tile(batch):
    b8 = _round_up(batch, 8)
    if b8 <= 512:
        return b8                       # one small step; padding bounded to <8 rows
    # >=2 grid steps so both v7x TensorCores get work; tile capped to bound the
    # VMEM working set and padding waste.
    n_steps = max(2, pl.cdiv(b8, MAX_TILE_B))
    return _round_up(pl.cdiv(b8, n_steps), 8)


@jax.jit
def mlp_vae_forward(x, eps, w_slab):
    """Returns (outs, mu, log_var, embeddings, z, grid=None)."""
    B = x.shape[0]
    xin = jnp.concatenate([x, eps], axis=-1)          # single packed input stream
    tile_b = _choose_tile(B)
    b_pad = pl.cdiv(B, tile_b) * tile_b
    if b_pad != B:
        xin = jnp.pad(xin, ((0, b_pad - B), (0, 0)))

    flops = 2 * b_pad * (IN_DIM * HIDDEN + HIDDEN * (EMB_DIM + 2 * LATENT)
                         + LATENT * HIDDEN + HIDDEN * OUT_DIM)
    bytes_accessed = b_pad * (XIN_W + OUT_W) * 4 + W_ROWS * 128 * 2
    cost = pl.CostEstimate(flops=flops, transcendentals=b_pad * LATENT,
                           bytes_accessed=bytes_accessed)

    slab = pl.pallas_call(
        _vae_kernel,
        out_shape=jax.ShapeDtypeStruct((b_pad, OUT_W), jnp.float32),
        grid=(b_pad // tile_b,),
        in_specs=[
            pl.BlockSpec((tile_b, XIN_W), lambda i: (i, 0)),   # [x | eps], batch-tiled
            pl.BlockSpec((W_ROWS, 128), lambda i: (0, 0)),     # weights, VMEM-resident
        ],
        out_specs=pl.BlockSpec((tile_b, OUT_W), lambda i: (i, 0)),
        compiler_params=pltpu.CompilerParams(
            dimension_semantics=("parallel",)),
        cost_estimate=cost,
    )(xin, w_slab)

    outs = slab[:B, C_OUT:C_OUT + OUT_DIM]
    emb = slab[:B, C_EMB:C_EMB + EMB_DIM]
    mu = slab[:B, C_MU:C_MU + LATENT]
    log_var = slab[:B, C_LV:C_LV + LATENT]
    z = slab[:B, C_Z:C_Z + LATENT]
    grid = None  # TODO(synk): real decoder also returns `grid`; unknown here.
    return outs, mu, log_var, emb, z, grid


def init_params(key):
    """Deterministic parameter init. Linear weights stored as [in, out]."""
    ks = jax.random.split(key, 8)

    def lin(k, fan_in, fan_out):
        # PyTorch-style uniform(-1/sqrt(fan_in), 1/sqrt(fan_in))
        bound = 1.0 / jnp.sqrt(fan_in)
        kw, kb = jax.random.split(k)
        w = jax.random.uniform(kw, (fan_in, fan_out), jnp.float32, -bound, bound)
        b = jax.random.uniform(kb, (1, fan_out), jnp.float32, -bound, bound)
        return w, b

    we1, be1 = lin(ks[0], IN_DIM, HIDDEN)     # encoder layer 1
    we2, be2 = lin(ks[1], HIDDEN, EMB_DIM)    # encoder layer 2 -> 50
    wmu, bmu = lin(ks[2], EMB_DIM, LATENT)    # enc_mu
    wlv, blv = lin(ks[3], EMB_DIM, LATENT)    # enc_log_var
    wfd, bfd = lin(ks[4], LATENT, EMB_DIM)    # fc_dec
    wd1, bd1 = lin(ks[5], EMB_DIM, HIDDEN)    # decoder layer 1
    wd2, bd2 = lin(ks[6], HIDDEN, OUT_DIM)    # decoder layer 2
    return dict(we1=we1, be1=be1, we2=we2, be2=be2,
                wmu=wmu, bmu=bmu, wlv=wlv, blv=blv,
                wfd=wfd, bfd=bfd,
                wd1=wd1, bd1=bd1, wd2=wd2, bd2=bd2)


def pack_params(p):
    """Fold fc_dec into decoder L1, fuse emb|mu|log_var, pack into one bf16 slab."""
    wd1f = p["wfd"] @ p["wd1"]                         # [LATENT, HIDDEN]
    bd1f = p["bfd"] @ p["wd1"] + p["bd1"]              # [1, HIDDEN]
    wml = jnp.concatenate([p["wmu"], p["wlv"]], axis=1)        # [EMB_DIM, 2*LATENT]
    bml = jnp.concatenate([p["bmu"], p["blv"]], axis=1)        # [1, 2*LATENT]
    we2ml = jnp.concatenate([p["we2"], p["we2"] @ wml], axis=1)        # [HIDDEN, 66]
    be2ml = jnp.concatenate([p["be2"], p["be2"] @ wml + bml], axis=1)  # [1, 66]

    slab = jnp.zeros((W_ROWS, 128), jnp.float32)

    def put(s, r, w):
        return s.at[r:r + w.shape[0], 0:w.shape[1]].set(w)

    slab = put(slab, R_WE1, p["we1"])
    slab = put(slab, R_WE2ML, we2ml)
    slab = put(slab, R_WD1, wd1f)
    slab = put(slab, R_WD2, p["wd2"])
    slab = put(slab, R_BIAS + 0, p["be1"])
    slab = put(slab, R_BIAS + 1, be2ml)
    slab = put(slab, R_BIAS + 2, bd1f)
    slab = put(slab, R_BIAS + 3, p["bd2"])
    # bf16 MXU operands (f32 accumulation in-kernel); biases also live in the
    # bf16 slab and are cast back to f32 for the elementwise adds.
    return slab.astype(jnp.bfloat16)


def _reference_forward(x, eps, p):
    """Pure-JAX f32 reference matching the unfused PyTorch math."""
    h = jnp.maximum(x @ p["we1"] + p["be1"], 0.0)
    emb = h @ p["we2"] + p["be2"]
    mu = emb @ p["wmu"] + p["bmu"]
    log_var = emb @ p["wlv"] + p["blv"]
    z = mu + jnp.exp(0.5 * log_var) * eps
    up = z @ p["wfd"] + p["bfd"]
    hd = jnp.maximum(up @ p["wd1"] + p["bd1"], 0.0)
    outs = hd @ p["wd2"] + p["bd2"]
    return outs, mu, log_var, emb, z


if __name__ == "__main__":
    key = jax.random.PRNGKey(0)
    k_param, k_x, k_eps = jax.random.split(key, 3)

    B = 2
    x = jax.random.normal(k_x, (B, IN_DIM), jnp.float32)
    eps = jax.random.normal(k_eps, (B, LATENT), jnp.float32)  # reparam noise
    params = init_params(k_param)
    w_slab = pack_params(params)

    outs, mu, log_var, emb, z, grid = mlp_vae_forward(x, eps, w_slab)
    jax.block_until_ready((outs, mu, log_var, emb, z))

    assert outs.shape == (B, OUT_DIM)
    assert mu.shape == (B, LATENT)
    assert log_var.shape == (B, LATENT)
    assert emb.shape == (B, EMB_DIM)
    assert z.shape == (B, LATENT)

    # numerical check against the unfused f32 reference (looser tolerance:
    # matmul operands are bf16 on the MXU, accumulation f32)
    r_outs, r_mu, r_lv, r_emb, r_z = _reference_forward(x, eps, params)
    for got, want in ((outs, r_outs), (mu, r_mu), (log_var, r_lv),
                      (emb, r_emb), (z, r_z)):
        assert bool(jnp.allclose(got, want, rtol=5e-2, atol=5e-2))

    print("KERNEL_OK")
</pallas_src>

<mosaic_0001>
module attributes {stable_mosaic.version = 11 : i64} {
  func.func @_vae_kernel(%arg0: i32, %arg1: memref<8x40xf32, #tpu.memory_space<vmem>>, %arg2: memref<112x128xbf16, #tpu.memory_space<vmem>>, %arg3: memref<8x106xf32, #tpu.memory_space<vmem>>) attributes {dimension_semantics = [#tpu.dimension_semantics<parallel>], iteration_bounds = array<i64: 1>, scalar_prefetch = 0 : i64, scratch_operands = 0 : i64, tpu.core_type = #tpu.core_type<tc>, window_params = [{transform_indices = @transform_0, window_bounds = array<i64: 8, 40>}, {pipeline_mode = #tpu.pipeline_mode<synchronous>, transform_indices = @transform_1, window_bounds = array<i64: 112, 128>}, {transform_indices = @transform_2, window_bounds = array<i64: 8, 106>}]} {
    %c0 = arith.constant 0 : index
    %c0_0 = arith.constant 0 : index
    %0 = vector.load %arg1[%c0, %c0_0] : memref<8x40xf32, #tpu.memory_space<vmem>>, vector<8x40xf32>
    %1 = vector.extract_strided_slice %0 {offsets = [0, 0], sizes = [8, 32], strides = [1, 1]} : vector<8x40xf32> to vector<8x32xf32>
    %2 = arith.truncf %1 : vector<8x32xf32> to vector<8x32xbf16>
    %3 = vector.extract_strided_slice %0 {offsets = [0, 32], sizes = [8, 8], strides = [1, 1]} : vector<8x40xf32> to vector<8x8xf32>
    %c0_1 = arith.constant 0 : index
    %c0_2 = arith.constant 0 : index
    %4 = vector.load %arg2[%c0_1, %c0_2] : memref<112x128xbf16, #tpu.memory_space<vmem>>, vector<32x32xbf16>
    %c104 = arith.constant 104 : index
    %c0_3 = arith.constant 0 : index
    %5 = vector.load %arg2[%c104, %c0_3] : memref<112x128xbf16, #tpu.memory_space<vmem>>, vector<1x32xbf16>
    %6 = arith.extf %5 : vector<1x32xbf16> to vector<1x32xf32>
    %cst = arith.constant dense<0.000000e+00> : vector<8x32xf32>
    %7 = tpu.matmul %2, %4, %cst {dimension_numbers = #tpu.dot_dimension_numbers<[1], [0], [0], [1], [0, 0, 1, 1], [], []>} : vector<8x32xbf16>, vector<32x32xbf16>, vector<8x32xf32> -> vector<8x32xf32>
    %8 = vector.broadcast %6 : vector<1x32xf32> to vector<8x32xf32>
    %9 = arith.addf %7, %8 : vector<8x32xf32>
    %cst_4 = arith.constant 0.000000e+00 : f32
    %10 = vector.broadcast %cst_4 : f32 to vector<8x32xf32>
    %11 = arith.maximumf %9, %10 : vector<8x32xf32>
    %c32 = arith.constant 32 : index
    %c0_5 = arith.constant 0 : index
    %12 = vector.load %arg2[%c32, %c0_5] : memref<112x128xbf16, #tpu.memory_space<vmem>>, vector<32x66xbf16>
    %c105 = arith.constant 105 : index
    %c0_6 = arith.constant 0 : index
    %13 = vector.load %arg2[%c105, %c0_6] : memref<112x128xbf16, #tpu.memory_space<vmem>>, vector<1x66xbf16>
    %14 = arith.extf %13 : vector<1x66xbf16> to vector<1x66xf32>
    %15 = arith.truncf %11 : vector<8x32xf32> to vector<8x32xbf16>
    %cst_7 = arith.constant dense<0.000000e+00> : vector<8x66xf32>
    %16 = tpu.matmul %15, %12, %cst_7 {dimension_numbers = #tpu.dot_dimension_numbers<[1], [0], [0], [1], [0, 0, 1, 1], [], []>} : vector<8x32xbf16>, vector<32x66xbf16>, vector<8x66xf32> -> vector<8x66xf32>
    %17 = vector.broadcast %14 : vector<1x66xf32> to vector<8x66xf32>
    %18 = arith.addf %16, %17 : vector<8x66xf32>
    %19 = vector.extract_strided_slice %18 {offsets = [0, 0], sizes = [8, 50], strides = [1, 1]} : vector<8x66xf32> to vector<8x50xf32>
    %20 = vector.extract_strided_slice %18 {offsets = [0, 50], sizes = [8, 16], strides = [1, 1]} : vector<8x66xf32> to vector<8x16xf32>
    %21 = vector.extract_strided_slice %20 {offsets = [0, 0], sizes = [8, 8], strides = [1, 1]} : vector<8x16xf32> to vector<8x8xf32>
    %22 = vector.extract_strided_slice %20 {offsets = [0, 8], sizes = [8, 8], strides = [1, 1]} : vector<8x16xf32> to vector<8x8xf32>
    %cst_8 = arith.constant 5.000000e-01 : f32
    %23 = vector.broadcast %cst_8 : f32 to vector<8x8xf32>
    %24 = arith.mulf %23, %22 : vector<8x8xf32>
    %25 = math.exp %24 : vector<8x8xf32>
    %26 = arith.mulf %25, %3 : vector<8x8xf32>
    %27 = arith.addf %21, %26 : vector<8x8xf32>
    %c64 = arith.constant 64 : index
    %c0_9 = arith.constant 0 : index
    %28 = vector.load %arg2[%c64, %c0_9] : memref<112x128xbf16, #tpu.memory_space<vmem>>, vector<8x32xbf16>
    %c106 = arith.constant 106 : index
    %c0_10 = arith.constant 0 : index
    %29 = vector.load %arg2[%c106, %c0_10] : memref<112x128xbf16, #tpu.memory_space<vmem>>, vector<1x32xbf16>
    %30 = arith.extf %29 : vector<1x32xbf16> to vector<1x32xf32>
    %31 = arith.truncf %27 : vector<8x8xf32> to vector<8x8xbf16>
    %cst_11 = arith.constant dense<0.000000e+00> : vector<8x32xf32>
    %32 = tpu.matmul %31, %28, %cst_11 {dimension_numbers = #tpu.dot_dimension_numbers<[1], [0], [0], [1], [0, 0, 1, 1], [], []>} : vector<8x8xbf16>, vector<8x32xbf16>, vector<8x32xf32> -> vector<8x32xf32>
    %33 = vector.broadcast %30 : vector<1x32xf32> to vector<8x32xf32>
    %34 = arith.addf %32, %33 : vector<8x32xf32>
    %cst_12 = arith.constant 0.000000e+00 : f32
    %35 = vector.broadcast %cst_12 : f32 to vector<8x32xf32>
    %36 = arith.maximumf %34, %35 : vector<8x32xf32>
    %c72 = arith.constant 72 : index
    %c0_13 = arith.constant 0 : index
    %37 = vector.load %arg2[%c72, %c0_13] : memref<112x128xbf16, #tpu.memory_space<vmem>>, vector<32x32xbf16>
    %c107 = arith.constant 107 : index
    %c0_14 = arith.constant 0 : index
    %38 = vector.load %arg2[%c107, %c0_14] : memref<112x128xbf16, #tpu.memory_space<vmem>>, vector<1x32xbf16>
    %39 = arith.extf %38 : vector<1x32xbf16> to vector<1x32xf32>
    %40 = arith.truncf %36 : vector<8x32xf32> to vector<8x32xbf16>
    %cst_15 = arith.constant dense<0.000000e+00> : vector<8x32xf32>
    %41 = tpu.matmul %40, %37, %cst_15 {dimension_numbers = #tpu.dot_dimension_numbers<[1], [0], [0], [1], [0, 0, 1, 1], [], []>} : vector<8x32xbf16>, vector<32x32xbf16>, vector<8x32xf32> -> vector<8x32xf32>
    %42 = vector.broadcast %39 : vector<1x32xf32> to vector<8x32xf32>
    %43 = arith.addf %41, %42 : vector<8x32xf32>
    %44 = tpu.concatenate %43, %19, %20, %27 in 1 : vector<8x32xf32>, vector<8x50xf32>, vector<8x16xf32>, vector<8x8xf32> -> vector<8x106xf32>
    %c0_16 = arith.constant 0 : index
    %c0_17 = arith.constant 0 : index
    %45 = vector.load %arg3[%c0_16, %c0_17] : memref<8x106xf32, #tpu.memory_space<vmem>>, vector<8x106xf32>
    tpu.vector_store %arg3[%c0_16, %c0_17], %44 {strides = array<i32>} : memref<8x106xf32, #tpu.memory_space<vmem>>, vector<8x106xf32>,
    return
  }
  func.func @transform_0(%arg0: i32) -> (i32, i32) {
    %c0_i32 = arith.constant 0 : i32
    %c0_i32_0 = arith.constant 0 : i32
    return %arg0, %c0_i32 : i32, i32
  }
  func.func @transform_1(%arg0: i32) -> (i32, i32) {
    %c0_i32 = arith.constant 0 : i32
    %c0_i32_0 = arith.constant 0 : i32
    %c0_i32_1 = arith.constant 0 : i32
    return %c0_i32, %c0_i32_0 : i32, i32
  }
  func.func @transform_2(%arg0: i32) -> (i32, i32) {
    %c0_i32 = arith.constant 0 : i32
    %c0_i32_0 = arith.constant 0 : i32
    return %arg0, %c0_i32 : i32, i32
  }
}

</mosaic_0001>

<bundles_post_ra>
// kernel: mlp_vae_forward.1
= control target key start
LH: loop header
LB: loop body
LE: loop exit
PB: predicated region body
PF: predicated region fallthrough
CT: control target
= control target key end

     0   :  { %7 = vsyncpa [#allocation3], 0  ;;  %s409_s9 = smov [#allocation2]   ;;  %s466_s0 = inlined_call_operand.vmem [shape: f32[8,40], index: 0, kind: input, shape index: {}]   ;;  %s467_s1 = inlined_call_operand.hbm [shape: bf16[112,128], index: 1, kind: input, shape index: {}]   ;;  %s468_s2 = inlined_call_operand.vmem [shape: f32[8,106], index: 2, kind: output, shape index: {}]  }
   0x1   :  { %s15_s10 = sshll.u32 %s409_s9, 4  ;;  %s385_s13 = scalar_lea.hbm %s467_s1, 896  ;;  %s16_s10 = int_to_ptr.vmem [resolvable:$true] %s15_s10 }
   0x2   :  { %p386_p0 = scmp.ne.s32.totalorder %s467_s1, %s385_s13  ;;  %p389_p1 = scmp.lt.u32.totalorder %s385_s13, %s467_s1 }
   0x4   :  { %p391_p2 = pnand %p389_p1, %p386_p0 }
   0x6   :  { %394 = shalt.err (!%p391_p2)
}
   0x7   :  { %s395_s18 = scalar_lea.vmem %s16_s10, 896  ;;  %p400_p4 = scmp.lt.s32.totalorder %s16_s10, %s16_s10 }
   0x8   :  { %p396_p3 = scmp.ne.s32.totalorder %s16_s10, %s395_s18  ;;  %p401_p5 = scmp.lt.s32.totalorder %s395_s18, %s395_s18 }
   0xa   :  { %p402_p6 = por %p401_p5, %p400_p4 }
   0xc   :  { %p403_p7 = pnand %p402_p6, %p396_p3 }
   0xe   :  { %406 = shalt.err (!%p403_p7)
}
   0xf   :  { %s410_s19 = smov 64   ;;  %s411_s20 = smov 4  }
  0x10   :  { %21 = dma.hbm_to_vmem [thread:$0]  %s467_s1, 896, %s16_s10, [#allocation3], %s410_s19, %s410_s19, %s411_s20  }
  0x11   :  { %407 = dma.done.wait [#allocation3], 896  }
  0x12   :  { %408 = vsyncadd [#allocation3], 4294966400  ;;  %v412_v0 = vmov 0.0   ;;  %vm413_vm0 = vmmov 0   ;;  %v377_v1 = vld [vmem:[#allocation2] sm:$0xff]   ;;  %v378_v2 = vld [vmem:[#allocation2 + $0x8] sm:$0xff]   ;;  %v34_v7 = vlaneseq }
  0x13   :  { %337 = vmatprep.subr.bf16.mxu0 %v412_v0  ;;  %341 = vmatprep.mubr.msk.bf16.mxu0 %vm413_vm0, %v412_v0  ;;  %v26_v3 = vld [vmem:[%s466_s0] sm:$0xff]  ;;  %vm50_vm1 = vcmask 261120   ;;  %v379_v5 = vld [vmem:[#allocation2 + $0x10] sm:$0xff]   ;;  %v380_v6 = vld [vmem:[#allocation2 + $0x18] sm:$0xff]   ;;  %s414_s1 = smov 26   ;;  %vm187_vm2 = vcmask 1043456  }
  0x14   :  { %345 = vmatprep.subr.bf16.mxu1 %v412_v0  ;;  %349 = vmatprep.mubr.msk.bf16.mxu1 %vm413_vm0, %v412_v0  ;;  %v27_v4 = vpack.c.bf16 %v26_v3, %v26_v3  ;;  %v453_v8 = vshrl.u32 %v34_v7, 7  ;;  %v32_v9 = vld [vmem:[#allocation2 + $0x34] sm:$0x1]  ;;  %v172_v30 = vld [vmem:[#allocation2 + $0x20] sm:$0xf]  ;;  %s415_s0 = smov 120  }
  0x15   :  { %338 = vmatpush3.bf16.msra.mxu0 %v377_v1  ;;  %346 = vmatpush3.bf16.msra.mxu1 %v379_v5  ;;  %v33_v10 = vunpack.c.l.bf16 %v32_v9  ;;  %v189_v31 = vsel %vm187_vm2, %v172_v30, 0  ;;  %v381_v34 = vld [vmem:[#allocation2 + $0x24] sm:$0xff]   ;;  %s416_s25 = smov 48   ;;  %s417_s26 = smov 78   ;;  %vm183_vm3 = vcmask 64512   ;;  %v382_v39 = vld [vmem:[#allocation2 + $0x2c] sm:$0xff]  }
  0x16   :  { %339 = vmatprep.subr.bf16.mxu0 %v412_v0  ;;  %347 = vmatprep.subr.bf16.mxu1 %v412_v0  ;;  %v36_v11 = vsub.s32 0, %v453_v8  ;;  %v102_v20 = vsub.s32 1, %v453_v8  ;;  %s418_s27 = smov 32   ;;  %v173_v40 = vld [vmem:[#allocation2 + $0x34] sm:$0x2]  ;;  %v178_v42 = vsub.s32 2, %v453_v8 }
  0x17   :  { %163 = vrot.lane.b32.xlu0 %v26_v3, %s414_s1  ;;  %v174_v41 = vunpack.c.l.bf16 %v173_v40  ;;  %v239_v51 = vsub.s32 3, %v453_v8  ;;  %vm305_vm4 = vcmask 670720   ;;  %vm307_vm5 = vcmask 801792  }
  0x18   :  { %v37_v12 = vrot.slane %v33_v10, %v36_v11  ;;  %v103_v21 = vrot.slane %v33_v10, %v102_v20  ;;  %vm309_vm6 = vcmask 867328  }
  0x19   :  { %340 = vmatpush3.bf16.msra.mxu0 %v378_v2  ;;  %348 = vmatpush3.bf16.msra.mxu1 %v380_v6  ;;  %v179_v43 = vrot.slane %v174_v41, %v178_v42  ;;  %v240_v52 = vrot.slane %v174_v41, %v239_v51 }
  0x1a   :  { %353 = vmatprep.subr.bf16.mxu0 %v412_v0  ;;  %359 = vmatprep.subr.bf16.mxu1 %v412_v0 }
  0x1c   :  { %342 = vmatmul.mubr.msk.bf16.vlgmr.msra.gmra.mrb[0].mxu0 %vm50_vm1, %v27_v4 }
  0x1d   :  { %355 = vmatprep.mubr.msk.bf16.mxu0 %vm413_vm0, %v412_v0  ;;  %354 = vmatpush3.bf16.msra.mxu0 %v189_v31 }
  0x89   :  { %v164_v29 = vpop.permute.xlu0 %163 }
  0xef   :  { %v88_v13 = vpop.f32.mrb[0].mxu0 }
  0xf0   :  { %v89_v14 = vadd.f32 %v88_v13, %v37_v12  ;;  %v343_v15 = vpop.f32.mrb[1].mxu0 }
  0xf1   :  { %v91_v16 = vpop.f32.mrb[2].mxu0 }
  0xf2   :  { %v94_v17 = vmax.f32 %v89_v14, 0.0  ;;  %v344_v18 = vpop.f32.mrb[3].mxu0 }
  0xf4   :  { %v99_v19 = vpack.c.bf16 %v94_v17, %v94_v17 }
  0xf6   :  { %350 = vmatmul.mubr.msk.bf16.vlgmr.msra.gmra.mrb[0].mxu1 %vm50_vm1, %v99_v19 }
  0xf7   :  { %363 = vmatprep.mubr.msk.bf16.mxu1 %vm413_vm0, %v412_v0  ;;  %360 = vmatpush3.bf16.msra.mxu1 %v381_v34 }
  0xf8   :  { %361 = vmatprep.subr.bf16.mxu1 %v412_v0 }
  0xfb   :  { %362 = vmatpush3.bf16.msra.mxu1 %v382_v39 }
 0x1c9   :  { %v153_v22 = vpop.f32.mrb[0].mxu1 }
 0x1ca   :  { %v154_v23 = vadd.f32 %v153_v22, %v103_v21  ;;  %v351_v24 = vpop.f32.mrb[1].mxu1 }
 0x1cb   :  { %v156_v25 = vpop.f32.mrb[2].mxu1 }
 0x1cc   :  { %v159_v26 = vmul.f32 0.5, %v154_v23  ;;  %v352_v27 = vpop.f32.mrb[3].mxu1 }
 0x1ce   :  { %v160_v28 = vmul.f32 1.442695, %v159_v26 }
 0x1d0   :  { %383 = vpow2.f32 %v160_v28 }
 0x1da   :  { %v384_v32 = vpop.eup %383 }
 0x1db   :  { %v166_v33 = vmul.f32 %v384_v32, %v164_v29 }
 0x1dd   :  { %168 = vrot.lane.b32.xlu0 %v166_v33, %s415_s0 }
 0x24f   :  { %v169_v35 = vpop.permute.xlu0 %168 }
 0x250   :  { %v171_v36 = vadd.f32 %v169_v35, %v154_v23 }
 0x252   :  { %301 = vrot.lane.b32.xlu0 %v171_v36, %s416_s25  ;;  %v175_v37 = vpack.c.bf16 %v171_v36, %v171_v36 }
 0x254   :  { %181 = vrot.lane.b32.xlu1 %v175_v37, %s417_s26 }
 0x258   :  { %297 = vrot.lane.b32.xlu1 %v154_v23, %s418_s27 }
 0x2c4   :  { %v302_v60 = vpop.permute.xlu0 %301 }
 0x2c6   :  { %v182_v38 = vpop.permute.xlu1 %181 }
 0x2c7   :  { %356 = vmatmul.mubr.msk.bf16.vlgmr.msra.gmra.mrb[4].mxu0 %vm183_vm3, %v182_v38 }
 0x2ca   :  { %v298_v56 = vpop.permute.xlu1 %297 }
 0x39a   :  { %v225_v44 = vpop.f32.mrb[4].mxu0 }
 0x39b   :  { %v226_v45 = vadd.f32 %v225_v44, %v179_v43  ;;  %v357_v46 = vpop.f32.mrb[5].mxu0 }
 0x39c   :  { %v228_v47 = vpop.f32.mrb[6].mxu0 }
 0x39d   :  { %v231_v48 = vmax.f32 %v226_v45, 0.0  ;;  %v358_v49 = vpop.f32.mrb[7].mxu0 }
 0x39f   :  { %v236_v50 = vpack.c.bf16 %v231_v48, %v231_v48 }
 0x3a1   :  { %364 = vmatmul.mubr.msk.bf16.vlgmr.msra.gmra.mrb[4].mxu1 %vm50_vm1, %v236_v50 }
 0x474   :  { %v290_v53 = vpop.f32.mrb[4].mxu1 }
 0x475   :  { %v291_v54 = vadd.f32 %v290_v53, %v240_v52  ;;  %v365_v55 = vpop.f32.mrb[5].mxu1 }
 0x476   :  { %v293_v57 = vpop.f32.mrb[6].mxu1 }
 0x477   :  { %v304_v58 = vsel %vm50_vm1, %v291_v54, %v298_v56  ;;  %v366_v59 = vpop.f32.mrb[7].mxu1 }
 0x478   :  { %v306_v61 = vsel %vm305_vm4, %v304_v58, %v298_v56 }
 0x479   :  { %v308_v62 = vsel %vm307_vm5, %v306_v61, %v302_v60 }
 0x47a   :  { %310 = vst.msk [vmem:[%s468_s2] sm:$0xff] %vm309_vm6, %v308_v62 }
 0x47b   :  { %315 = vsyncpa [#allocation3], 1 }

</bundles_post_ra>
